<compile_context>
chip_gen: v7x
topology: tpu7x:2x2x1
jax: 0.10.0
libtpu: 0.0.40
codegen_flags: <defaults>
</compile_context>

<pallas_src>
import math

import jax
import jax.numpy as jnp
from jax import lax
from jax.experimental import pallas as pl
from jax.experimental.pallas import tpu as pltpu

B, S, H = 2, 8, 32
NH = 4
D = H // NH
BS = B * S
SCALE = 1.0 / math.sqrt(D)

_CONTRACT_LAST = (((1,), (1,)), ((), ()))   # a @ b.T on the MXU
_NEG_BIG = -1e30                            # cross-batch block bias (kernel-internal)


def _make_kernel(act_as_identity: bool, has_add: bool):
    """Kernel specialized (at trace time) on which interventions are active."""

    def kernel(x_ref, mask_ref, wqkv_ref, wo_ref, *rest):
        if has_add:
            add_ref, out_ref = rest
        else:
            add_ref = None
            (out_ref,) = rest

        x = x_ref[...]                                   # (B*S, H), batch folded into rows

        # --- fused QKV projection: one (B*S,H) x (3H,H)^T matmul on the MXU.
        qkv = lax.dot_general(x, wqkv_ref[...], _CONTRACT_LAST,
                              preferred_element_type=jnp.float32)        # (B*S, 3H)
        q = qkv[:, 0:H] * SCALE                          # scale once for all heads
        k = qkv[:, H:2 * H]
        v = qkv[:, 2 * H:3 * H]

        # --- block-diagonal additive bias over the folded (B*S, B*S) score
        #     matrix, built once and reused by every head; act_as_identity is
        #     applied to the per-batch (S,S) mask here.
        if act_as_identity:
            neg = mask_ref[0, 0, 0:1, 1:2].astype(jnp.float32)           # (1, 1)
            row = lax.broadcasted_iota(jnp.int32, (S, S), 0)
            col = lax.broadcasted_iota(jnp.int32, (S, S), 1)
            tril_strict = (col < row).astype(jnp.float32)

        neg_block = jnp.full((S, S), _NEG_BIG, jnp.float32)
        row_blocks = []
        for bq in range(B):
            blocks = []
            for bk in range(B):
                if bq == bk:
                    mb = mask_ref[bq, 0].astype(jnp.float32)             # (S, S)
                    if act_as_identity:
                        mb = mb + neg * tril_strict
                    blocks.append(mb)
                else:
                    blocks.append(neg_block)
            row_blocks.append(jnp.concatenate(blocks, axis=1) if B > 1 else blocks[0])
        bias = (jnp.concatenate(row_blocks, axis=0)
                if B > 1 else row_blocks[0])                             # (B*S, B*S)

        # --- per-head attention, statically unrolled (NH=4); all ops 2-D,
        #     no scratch round-trips, no head-major relayout.
        ctx_heads = []
        for h in range(NH):
            lo = h * D
            qh = q[:, lo:lo + D]                                         # (B*S, D)
            kh = k[:, lo:lo + D]
            vh = v[:, lo:lo + D]

            s = lax.dot_general(qh, kh, _CONTRACT_LAST,
                                preferred_element_type=jnp.float32)      # (B*S, B*S)
            s = s + bias
            m = jnp.max(s, axis=-1, keepdims=True)
            p = jnp.exp(s - m)
            l = jnp.sum(p, axis=-1, keepdims=True)
            p = p * pl.reciprocal(l, approx=True)                        # divide on the EUP
            ctx_heads.append(jnp.dot(p, vh,
                                     preferred_element_type=jnp.float32))  # (B*S, D)

        # --- re-interleave heads along the feature axis; one output projection
        #     against the original (out, in) wo.
        ctx = jnp.concatenate(ctx_heads, axis=-1)                        # (B*S, H)
        o = lax.dot_general(ctx, wo_ref[...], _CONTRACT_LAST,
                            preferred_element_type=jnp.float32)          # (B*S, H)

        if has_add:
            o = o + add_ref[...].astype(jnp.float32)

        out_ref[...] = o.astype(out_ref.dtype)

    return kernel


def attn_wrapper_forward(hidden, attention_mask, params,
                         add_tensor=None, act_as_identity=False):
    """JAX wrapper mimicking AttnWrapper.forward; returns output[0] (= activations)."""
    wq, wk, wv, wo = params
    has_add = add_tensor is not None

    # Host-side structural glue only: fuse the three projection weights.
    wqkv = jnp.concatenate([wq, wk, wv], axis=0)                         # (3H, H)
    x2 = hidden.reshape(BS, H)

    inputs = [x2, attention_mask, wqkv, wo]
    in_specs = [
        pl.BlockSpec((BS, H), lambda i: (0, 0)),                         # hidden (rows = B*S)
        pl.BlockSpec((B, 1, S, S), lambda i: (0, 0, 0, 0)),              # attention_mask
        pl.BlockSpec((3 * H, H), lambda i: (0, 0)),                      # fused wqkv
        pl.BlockSpec((H, H), lambda i: (0, 0)),                          # wo
    ]
    if has_add:
        inputs.append(add_tensor.reshape(BS, H))
        in_specs.append(pl.BlockSpec((BS, H), lambda i: (0, 0)))

    out = pl.pallas_call(
        _make_kernel(act_as_identity, has_add),
        out_shape=jax.ShapeDtypeStruct((BS, H), hidden.dtype),
        grid=(1,),                                                       # single grid step
        in_specs=in_specs,
        out_specs=pl.BlockSpec((BS, H), lambda i: (0, 0)),
        compiler_params=pltpu.CompilerParams(
            dimension_semantics=("arbitrary",)),
    )(*inputs)
    return out.reshape(B, S, H)


def reference(hidden, attention_mask, params, add_tensor=None, act_as_identity=False):
    wq, wk, wv, wo = params
    mask = attention_mask
    if act_as_identity:
        tril = jnp.tril(jnp.ones(mask.shape, dtype=mask.dtype), k=-1)
        mask = mask + mask[0, 0, 0, 1] * tril
    q = jnp.einsum('bsh,oh->bso', hidden, wq)
    k = jnp.einsum('bsh,oh->bso', hidden, wk)
    v = jnp.einsum('bsh,oh->bso', hidden, wv)

    def heads(t):
        return t.reshape(B, S, NH, D).transpose(0, 2, 1, 3)  # (B, NH, S, D)

    qh, kh, vh = heads(q), heads(k), heads(v)
    s = jnp.einsum('bnqd,bnkd->bnqk', qh, kh) * SCALE + mask  # mask (B,1,S,S) broadcasts
    p = jax.nn.softmax(s, axis=-1)
    ctx = jnp.einsum('bnqk,bnkd->bnqd', p, vh).transpose(0, 2, 1, 3).reshape(B, S, H)
    o = jnp.einsum('bsh,oh->bso', ctx, wo)
    if add_tensor is not None:
        o = o + add_tensor
    return o


if __name__ == "__main__":
    key = jax.random.PRNGKey(0)
    k_x, k_q, k_k, k_v, k_o, k_add = jax.random.split(key, 6)

    hidden = jax.random.normal(k_x, (B, S, H), dtype=jnp.float32)
    wq = 0.05 * jax.random.normal(k_q, (H, H), dtype=jnp.float32)
    wk = 0.05 * jax.random.normal(k_k, (H, H), dtype=jnp.float32)
    wv = 0.05 * jax.random.normal(k_v, (H, H), dtype=jnp.float32)
    wo = 0.05 * jax.random.normal(k_o, (H, H), dtype=jnp.float32)
    add_tensor = 0.1 * jax.random.normal(k_add, (B, S, H), dtype=jnp.float32)

    # causal additive attention mask: 0 on/below diagonal, -1e9 above
    row = jnp.arange(S)[:, None]
    col = jnp.arange(S)[None, :]
    base_mask = jnp.where(col <= row, 0.0, -1e9).astype(jnp.float32)
    attention_mask = jnp.broadcast_to(base_mask, (B, 1, S, S))

    params = (wq, wk, wv, wo)

    # exercise both interventions (act_as_identity + add_tensor) plus the plain path
    out1 = attn_wrapper_forward(hidden, attention_mask, params,
                                add_tensor=add_tensor, act_as_identity=True)
    out2 = attn_wrapper_forward(hidden, attention_mask, params,
                                add_tensor=None, act_as_identity=False)
    jax.block_until_ready((out1, out2))

    ref1 = reference(hidden, attention_mask, params,
                     add_tensor=add_tensor, act_as_identity=True)
    ref2 = reference(hidden, attention_mask, params,
                     add_tensor=None, act_as_identity=False)

    # tolerance allows for the approx-EUP reciprocal in the softmax normalization
    assert jnp.allclose(out1, ref1, rtol=2e-3, atol=2e-3), "mismatch (intervened path)"
    assert jnp.allclose(out2, ref2, rtol=2e-3, atol=2e-3), "mismatch (plain path)"
    print("KERNEL_OK")
</pallas_src>

<mosaic_0001>
module attributes {stable_mosaic.version = 11 : i64} {
  func.func @kernel(%arg0: i32, %arg1: memref<16x32xf32, #tpu.memory_space<vmem>>, %arg2: memref<2x1x8x8xf32, #tpu.memory_space<vmem>>, %arg3: memref<96x32xf32, #tpu.memory_space<vmem>>, %arg4: memref<32x32xf32, #tpu.memory_space<vmem>>, %arg5: memref<16x32xf32, #tpu.memory_space<vmem>>, %arg6: memref<16x32xf32, #tpu.memory_space<vmem>>) attributes {dimension_semantics = [#tpu.dimension_semantics<arbitrary>], iteration_bounds = array<i64: 1>, scalar_prefetch = 0 : i64, scratch_operands = 0 : i64, tpu.core_type = #tpu.core_type<tc>, window_params = [{pipeline_mode = #tpu.pipeline_mode<synchronous>, transform_indices = @transform_0, window_bounds = array<i64: 16, 32>}, {pipeline_mode = #tpu.pipeline_mode<synchronous>, transform_indices = @transform_1, window_bounds = array<i64: 2, 1, 8, 8>}, {pipeline_mode = #tpu.pipeline_mode<synchronous>, transform_indices = @transform_2, window_bounds = array<i64: 96, 32>}, {pipeline_mode = #tpu.pipeline_mode<synchronous>, transform_indices = @transform_3, window_bounds = array<i64: 32, 32>}, {pipeline_mode = #tpu.pipeline_mode<synchronous>, transform_indices = @transform_4, window_bounds = array<i64: 16, 32>}, {pipeline_mode = #tpu.pipeline_mode<synchronous>, transform_indices = @transform_5, window_bounds = array<i64: 16, 32>}]} {
    %c0 = arith.constant 0 : index
    %c0_0 = arith.constant 0 : index
    %0 = vector.load %arg1[%c0, %c0_0] : memref<16x32xf32, #tpu.memory_space<vmem>>, vector<16x32xf32>
    %c0_1 = arith.constant 0 : index
    %c0_2 = arith.constant 0 : index
    %1 = vector.load %arg3[%c0_1, %c0_2] : memref<96x32xf32, #tpu.memory_space<vmem>>, vector<96x32xf32>
    %cst = arith.constant dense<0.000000e+00> : vector<16x96xf32>
    %2 = tpu.matmul %0, %1, %cst {dimension_numbers = #tpu.dot_dimension_numbers<[1], [1], [0], [0], [0, 0, 1, 0], [], []>} : vector<16x32xf32>, vector<96x32xf32>, vector<16x96xf32> -> vector<16x96xf32>
    %3 = vector.extract_strided_slice %2 {offsets = [0, 0], sizes = [16, 32], strides = [1, 1]} : vector<16x96xf32> to vector<16x32xf32>
    %cst_3 = arith.constant 0.353553385 : f32
    %4 = vector.broadcast %cst_3 : f32 to vector<16x32xf32>
    %5 = arith.mulf %3, %4 : vector<16x32xf32>
    %6 = vector.extract_strided_slice %2 {offsets = [0, 32], sizes = [16, 32], strides = [1, 1]} : vector<16x96xf32> to vector<16x32xf32>
    %7 = vector.extract_strided_slice %2 {offsets = [0, 64], sizes = [16, 32], strides = [1, 1]} : vector<16x96xf32> to vector<16x32xf32>
    %c0_4 = arith.constant 0 : index
    %c0_5 = arith.constant 0 : index
    %c0_6 = arith.constant 0 : index
    %c1 = arith.constant 1 : index
    %8 = vector.load %arg2[%c0_4, %c0_5, %c0_6, %c1] : memref<2x1x8x8xf32, #tpu.memory_space<vmem>>, vector<1x1x1x1xf32>
    %9 = vector.shape_cast %8 : vector<1x1x1x1xf32> to vector<1x1xf32>
    %10 = tpu.iota {dimensions = array<i32: 0>} : vector<8x8xi32>
    %11 = tpu.iota {dimensions = array<i32: 1>} : vector<8x8xi32>
    %12 = arith.cmpi slt, %11, %10 : vector<8x8xi32>
    %13 = arith.extui %12 : vector<8x8xi1> to vector<8x8xi32>
    %14 = arith.sitofp %13 : vector<8x8xi32> to vector<8x8xf32>
    %cst_7 = arith.constant -1.000000e+30 : f32
    %15 = vector.broadcast %cst_7 : f32 to vector<8x8xf32>
    %c0_8 = arith.constant 0 : index
    %c0_9 = arith.constant 0 : index
    %c0_10 = arith.constant 0 : index
    %c0_11 = arith.constant 0 : index
    %16 = vector.load %arg2[%c0_8, %c0_9, %c0_10, %c0_11] : memref<2x1x8x8xf32, #tpu.memory_space<vmem>>, vector<1x1x8x8xf32>
    %17 = vector.shape_cast %16 : vector<1x1x8x8xf32> to vector<8x8xf32>
    %18 = vector.broadcast %9 : vector<1x1xf32> to vector<8x8xf32>
    %19 = arith.mulf %18, %14 : vector<8x8xf32>
    %20 = arith.addf %17, %19 : vector<8x8xf32>
    %21 = tpu.concatenate %20, %15 in 1 : vector<8x8xf32>, vector<8x8xf32> -> vector<8x16xf32>
    %c1_12 = arith.constant 1 : index
    %c0_13 = arith.constant 0 : index
    %c0_14 = arith.constant 0 : index
    %c0_15 = arith.constant 0 : index
    %22 = vector.load %arg2[%c1_12, %c0_13, %c0_14, %c0_15] : memref<2x1x8x8xf32, #tpu.memory_space<vmem>>, vector<1x1x8x8xf32>
    %23 = vector.shape_cast %22 : vector<1x1x8x8xf32> to vector<8x8xf32>
    %24 = vector.broadcast %9 : vector<1x1xf32> to vector<8x8xf32>
    %25 = arith.mulf %24, %14 : vector<8x8xf32>
    %26 = arith.addf %23, %25 : vector<8x8xf32>
    %27 = tpu.concatenate %15, %26 in 1 : vector<8x8xf32>, vector<8x8xf32> -> vector<8x16xf32>
    %28 = tpu.concatenate %21, %27 in 0 : vector<8x16xf32>, vector<8x16xf32> -> vector<16x16xf32>
    %29 = vector.extract_strided_slice %5 {offsets = [0, 0], sizes = [16, 8], strides = [1, 1]} : vector<16x32xf32> to vector<16x8xf32>
    %30 = vector.extract_strided_slice %6 {offsets = [0, 0], sizes = [16, 8], strides = [1, 1]} : vector<16x32xf32> to vector<16x8xf32>
    %31 = vector.extract_strided_slice %7 {offsets = [0, 0], sizes = [16, 8], strides = [1, 1]} : vector<16x32xf32> to vector<16x8xf32>
    %cst_16 = arith.constant dense<0.000000e+00> : vector<16x16xf32>
    %32 = tpu.matmul %29, %30, %cst_16 {dimension_numbers = #tpu.dot_dimension_numbers<[1], [1], [0], [0], [0, 0, 1, 0], [], []>} : vector<16x8xf32>, vector<16x8xf32>, vector<16x16xf32> -> vector<16x16xf32>
    %33 = arith.addf %32, %28 : vector<16x16xf32>
    %cst_17 = arith.constant dense<0xFF800000> : vector<16xf32>
    %34 = vector.multi_reduction <maximumf>, %33, %cst_17 [1] : vector<16x16xf32> to vector<16xf32>
    %35 = vector.shape_cast %34 : vector<16xf32> to vector<16x1xf32>
    %36 = vector.broadcast %35 : vector<16x1xf32> to vector<16x16xf32>
    %37 = arith.subf %33, %36 : vector<16x16xf32>
    %38 = math.exp %37 : vector<16x16xf32>
    %cst_18 = arith.constant dense<0.000000e+00> : vector<16xf32>
    %39 = vector.multi_reduction <add>, %38, %cst_18 [1] : vector<16x16xf32> to vector<16xf32>
    %40 = vector.shape_cast %39 : vector<16xf32> to vector<16x1xf32>
    %41 = tpu.reciprocal %40 {approx = true} : vector<16x1xf32> -> vector<16x1xf32>
    %42 = vector.broadcast %41 : vector<16x1xf32> to vector<16x16xf32>
    %43 = arith.mulf %38, %42 : vector<16x16xf32>
    %cst_19 = arith.constant dense<0.000000e+00> : vector<16x8xf32>
    %44 = tpu.matmul %43, %31, %cst_19 {dimension_numbers = #tpu.dot_dimension_numbers<[1], [0], [0], [1], [0, 0, 1, 1], [], []>} : vector<16x16xf32>, vector<16x8xf32>, vector<16x8xf32> -> vector<16x8xf32>
    %45 = vector.extract_strided_slice %5 {offsets = [0, 8], sizes = [16, 8], strides = [1, 1]} : vector<16x32xf32> to vector<16x8xf32>
    %46 = vector.extract_strided_slice %6 {offsets = [0, 8], sizes = [16, 8], strides = [1, 1]} : vector<16x32xf32> to vector<16x8xf32>
    %47 = vector.extract_strided_slice %7 {offsets = [0, 8], sizes = [16, 8], strides = [1, 1]} : vector<16x32xf32> to vector<16x8xf32>
    %cst_20 = arith.constant dense<0.000000e+00> : vector<16x16xf32>
    %48 = tpu.matmul %45, %46, %cst_20 {dimension_numbers = #tpu.dot_dimension_numbers<[1], [1], [0], [0], [0, 0, 1, 0], [], []>} : vector<16x8xf32>, vector<16x8xf32>, vector<16x16xf32> -> vector<16x16xf32>
    %49 = arith.addf %48, %28 : vector<16x16xf32>
    %cst_21 = arith.constant dense<0xFF800000> : vector<16xf32>
    %50 = vector.multi_reduction <maximumf>, %49, %cst_21 [1] : vector<16x16xf32> to vector<16xf32>
    %51 = vector.shape_cast %50 : vector<16xf32> to vector<16x1xf32>
    %52 = vector.broadcast %51 : vector<16x1xf32> to vector<16x16xf32>
    %53 = arith.subf %49, %52 : vector<16x16xf32>
    %54 = math.exp %53 : vector<16x16xf32>
    %cst_22 = arith.constant dense<0.000000e+00> : vector<16xf32>
    %55 = vector.multi_reduction <add>, %54, %cst_22 [1] : vector<16x16xf32> to vector<16xf32>
    %56 = vector.shape_cast %55 : vector<16xf32> to vector<16x1xf32>
    %57 = tpu.reciprocal %56 {approx = true} : vector<16x1xf32> -> vector<16x1xf32>
    %58 = vector.broadcast %57 : vector<16x1xf32> to vector<16x16xf32>
    %59 = arith.mulf %54, %58 : vector<16x16xf32>
    %cst_23 = arith.constant dense<0.000000e+00> : vector<16x8xf32>
    %60 = tpu.matmul %59, %47, %cst_23 {dimension_numbers = #tpu.dot_dimension_numbers<[1], [0], [0], [1], [0, 0, 1, 1], [], []>} : vector<16x16xf32>, vector<16x8xf32>, vector<16x8xf32> -> vector<16x8xf32>
    %61 = vector.extract_strided_slice %5 {offsets = [0, 16], sizes = [16, 8], strides = [1, 1]} : vector<16x32xf32> to vector<16x8xf32>
    %62 = vector.extract_strided_slice %6 {offsets = [0, 16], sizes = [16, 8], strides = [1, 1]} : vector<16x32xf32> to vector<16x8xf32>
    %63 = vector.extract_strided_slice %7 {offsets = [0, 16], sizes = [16, 8], strides = [1, 1]} : vector<16x32xf32> to vector<16x8xf32>
    %cst_24 = arith.constant dense<0.000000e+00> : vector<16x16xf32>
    %64 = tpu.matmul %61, %62, %cst_24 {dimension_numbers = #tpu.dot_dimension_numbers<[1], [1], [0], [0], [0, 0, 1, 0], [], []>} : vector<16x8xf32>, vector<16x8xf32>, vector<16x16xf32> -> vector<16x16xf32>
    %65 = arith.addf %64, %28 : vector<16x16xf32>
    %cst_25 = arith.constant dense<0xFF800000> : vector<16xf32>
    %66 = vector.multi_reduction <maximumf>, %65, %cst_25 [1] : vector<16x16xf32> to vector<16xf32>
    %67 = vector.shape_cast %66 : vector<16xf32> to vector<16x1xf32>
    %68 = vector.broadcast %67 : vector<16x1xf32> to vector<16x16xf32>
    %69 = arith.subf %65, %68 : vector<16x16xf32>
    %70 = math.exp %69 : vector<16x16xf32>
    %cst_26 = arith.constant dense<0.000000e+00> : vector<16xf32>
    %71 = vector.multi_reduction <add>, %70, %cst_26 [1] : vector<16x16xf32> to vector<16xf32>
    %72 = vector.shape_cast %71 : vector<16xf32> to vector<16x1xf32>
    %73 = tpu.reciprocal %72 {approx = true} : vector<16x1xf32> -> vector<16x1xf32>
    %74 = vector.broadcast %73 : vector<16x1xf32> to vector<16x16xf32>
    %75 = arith.mulf %70, %74 : vector<16x16xf32>
    %cst_27 = arith.constant dense<0.000000e+00> : vector<16x8xf32>
    %76 = tpu.matmul %75, %63, %cst_27 {dimension_numbers = #tpu.dot_dimension_numbers<[1], [0], [0], [1], [0, 0, 1, 1], [], []>} : vector<16x16xf32>, vector<16x8xf32>, vector<16x8xf32> -> vector<16x8xf32>
    %77 = vector.extract_strided_slice %5 {offsets = [0, 24], sizes = [16, 8], strides = [1, 1]} : vector<16x32xf32> to vector<16x8xf32>
    %78 = vector.extract_strided_slice %6 {offsets = [0, 24], sizes = [16, 8], strides = [1, 1]} : vector<16x32xf32> to vector<16x8xf32>
    %79 = vector.extract_strided_slice %7 {offsets = [0, 24], sizes = [16, 8], strides = [1, 1]} : vector<16x32xf32> to vector<16x8xf32>
    %cst_28 = arith.constant dense<0.000000e+00> : vector<16x16xf32>
    %80 = tpu.matmul %77, %78, %cst_28 {dimension_numbers = #tpu.dot_dimension_numbers<[1], [1], [0], [0], [0, 0, 1, 0], [], []>} : vector<16x8xf32>, vector<16x8xf32>, vector<16x16xf32> -> vector<16x16xf32>
    %81 = arith.addf %80, %28 : vector<16x16xf32>
    %cst_29 = arith.constant dense<0xFF800000> : vector<16xf32>
    %82 = vector.multi_reduction <maximumf>, %81, %cst_29 [1] : vector<16x16xf32> to vector<16xf32>
    %83 = vector.shape_cast %82 : vector<16xf32> to vector<16x1xf32>
    %84 = vector.broadcast %83 : vector<16x1xf32> to vector<16x16xf32>
    %85 = arith.subf %81, %84 : vector<16x16xf32>
    %86 = math.exp %85 : vector<16x16xf32>
    %cst_30 = arith.constant dense<0.000000e+00> : vector<16xf32>
    %87 = vector.multi_reduction <add>, %86, %cst_30 [1] : vector<16x16xf32> to vector<16xf32>
    %88 = vector.shape_cast %87 : vector<16xf32> to vector<16x1xf32>
    %89 = tpu.reciprocal %88 {approx = true} : vector<16x1xf32> -> vector<16x1xf32>
    %90 = vector.broadcast %89 : vector<16x1xf32> to vector<16x16xf32>
    %91 = arith.mulf %86, %90 : vector<16x16xf32>
    %cst_31 = arith.constant dense<0.000000e+00> : vector<16x8xf32>
    %92 = tpu.matmul %91, %79, %cst_31 {dimension_numbers = #tpu.dot_dimension_numbers<[1], [0], [0], [1], [0, 0, 1, 1], [], []>} : vector<16x16xf32>, vector<16x8xf32>, vector<16x8xf32> -> vector<16x8xf32>
    %93 = tpu.concatenate %44, %60, %76, %92 in 1 : vector<16x8xf32>, vector<16x8xf32>, vector<16x8xf32>, vector<16x8xf32> -> vector<16x32xf32>
    %c0_32 = arith.constant 0 : index
    %c0_33 = arith.constant 0 : index
    %94 = vector.load %arg4[%c0_32, %c0_33] : memref<32x32xf32, #tpu.memory_space<vmem>>, vector<32x32xf32>
    %cst_34 = arith.constant dense<0.000000e+00> : vector<16x32xf32>
    %95 = tpu.matmul %93, %94, %cst_34 {dimension_numbers = #tpu.dot_dimension_numbers<[1], [1], [0], [0], [0, 0, 1, 0], [], []>} : vector<16x32xf32>, vector<32x32xf32>, vector<16x32xf32> -> vector<16x32xf32>
    %c0_35 = arith.constant 0 : index
    %c0_36 = arith.constant 0 : index
    %96 = vector.load %arg5[%c0_35, %c0_36] : memref<16x32xf32, #tpu.memory_space<vmem>>, vector<16x32xf32>
    %97 = arith.addf %95, %96 : vector<16x32xf32>
    %c0_37 = arith.constant 0 : index
    %c0_38 = arith.constant 0 : index
    %98 = vector.load %arg6[%c0_37, %c0_38] : memref<16x32xf32, #tpu.memory_space<vmem>>, vector<16x32xf32>
    tpu.vector_store %arg6[%c0_37, %c0_38], %97 {strides = array<i32>} : memref<16x32xf32, #tpu.memory_space<vmem>>, vector<16x32xf32>,
    return
  }
  func.func @transform_0(%arg0: i32) -> (i32, i32) {
    %c0_i32 = arith.constant 0 : i32
    %c0_i32_0 = arith.constant 0 : i32
    %c0_i32_1 = arith.constant 0 : i32
    return %c0_i32, %c0_i32_0 : i32, i32
  }
  func.func @transform_1(%arg0: i32) -> (i32, i32, i32, i32) {
    %c0_i32 = arith.constant 0 : i32
    %c0_i32_0 = arith.constant 0 : i32
    %c0_i32_1 = arith.constant 0 : i32
    %c0_i32_2 = arith.constant 0 : i32
    %c0_i32_3 = arith.constant 0 : i32
    return %c0_i32, %c0_i32_0, %c0_i32_1, %c0_i32_2 : i32, i32, i32, i32
  }
  func.func @transform_2(%arg0: i32) -> (i32, i32) {
    %c0_i32 = arith.constant 0 : i32
    %c0_i32_0 = arith.constant 0 : i32
    %c0_i32_1 = arith.constant 0 : i32
    return %c0_i32, %c0_i32_0 : i32, i32
  }
  func.func @transform_3(%arg0: i32) -> (i32, i32) {
    %c0_i32 = arith.constant 0 : i32
    %c0_i32_0 = arith.constant 0 : i32
    %c0_i32_1 = arith.constant 0 : i32
    return %c0_i32, %c0_i32_0 : i32, i32
  }
  func.func @transform_4(%arg0: i32) -> (i32, i32) {
    %c0_i32 = arith.constant 0 : i32
    %c0_i32_0 = arith.constant 0 : i32
    %c0_i32_1 = arith.constant 0 : i32
    return %c0_i32, %c0_i32_0 : i32, i32
  }
  func.func @transform_5(%arg0: i32) -> (i32, i32) {
    %c0_i32 = arith.constant 0 : i32
    %c0_i32_0 = arith.constant 0 : i32
    %c0_i32_1 = arith.constant 0 : i32
    return %c0_i32, %c0_i32_0 : i32, i32
  }
}

</mosaic_0001>

<bundles_post_ra>
// kernel: tpu_custom_call.1
= control target key start
LH: loop header
LB: loop body
LE: loop exit
PB: predicated region body
PF: predicated region fallthrough
CT: control target
= control target key end

     0   :  { %vm35_vm0 = vcmask 261120   ;;  %s1810_s0 = inlined_call_operand.vmem [shape: f32[16,32], index: 0, kind: input, shape index: {}]   ;;  %s1811_s1 = inlined_call_operand.vmem [shape: f32[2,1,8,8], index: 1, kind: input, shape index: {}]   ;;  %s1812_s2 = inlined_call_operand.vmem [shape: f32[96,32], index: 2, kind: input, shape index: {}]   ;;  %s1813_s3 = inlined_call_operand.vmem [shape: f32[32,32], index: 3, kind: input, shape index: {}]   ;;  %s1814_s4 = inlined_call_operand.vmem [shape: f32[16,32], index: 4, kind: input, shape index: {}]   ;;  %s1815_s5 = inlined_call_operand.hbm [shape: f32[16,32], index: 5, kind: output, shape index: {}]  }
   0x1   :  { %v23_v0 = vld [vmem:[%s1812_s2] sm:$0xff]  ;;  %v24_v1 = vld [vmem:[%s1812_s2 + $0x8] sm:$0xff]  ;;  %v25_v2 = vld [vmem:[%s1812_s2 + $0x10] sm:$0xff] }
   0x2   :  { %v1323_v3 = vpack.c.bf16 %v24_v1, %v23_v0  ;;  %vm1586_vm1 = vmpackc.low %vm35_vm0, %vm35_vm0  ;;  %v26_v5 = vld [vmem:[%s1812_s2 + $0x18] sm:$0xff]  ;;  %v21_v7 = vld [vmem:[%s1810_s0] sm:$0xff] }
   0x3   :  { %v1329_v6 = vpack.c.bf16 %v26_v5, %v25_v2  ;;  %1253 = vmatprep.mubr.msk.f32.mxu0 %vm35_vm0, %v21_v7 }
   0x4   :  { %1325 = vmatprep.subr.msk.bf16.mxu0 %vm1586_vm1, %v1323_v3 }
   0x5   :  { %1328 = vmatpush3.bf16.xpose.msk.msra.mxu0 %vm1586_vm1, %v1323_v3 }
   0x6   :  { %1331 = vmatprep.subr.msk.bf16.mxu0 %vm1586_vm1, %v1329_v6 }
   0x7   :  { %10 = vsyncpa [#allocation3], 0  ;;  %v27_v8 = vld [vmem:[%s1812_s2 + $0x20] sm:$0xff]  ;;  %v28_v9 = vld [vmem:[%s1812_s2 + $0x28] sm:$0xff]  ;;  %vm172_vm2 = vcmask 64512   ;;  %v156_v33 = vlaneseq  ;;  %v1529_v36 = vmov 0.0  }
   0x8   :  { %v1335_v10 = vpack.c.bf16 %v28_v9, %v27_v8  ;;  %v29_v11 = vld [vmem:[%s1812_s2 + $0x30] sm:$0xff]  ;;  %v30_v12 = vld [vmem:[%s1812_s2 + $0x38] sm:$0xff]  ;;  %v31_v14 = vld [vmem:[%s1812_s2 + $0x40] sm:$0xff]  ;;  %s1530_s26 = smov 8   ;;  %vm273_vm5 = vcmask 130048   ;;  %s1532_s29 = smov 120  }
   0x9   :  { %v1341_v13 = vpack.c.bf16 %v30_v12, %v29_v11  ;;  %v32_v15 = vld [vmem:[%s1812_s2 + $0x48] sm:$0xff]  ;;  %v33_v17 = vld [vmem:[%s1812_s2 + $0x50] sm:$0xff]  ;;  %v34_v18 = vld [vmem:[%s1812_s2 + $0x58] sm:$0xff]  ;;  %s1527_s2 = smov 96   ;;  %v157_v34 = vshrl.u32 %v156_v33, 7  ;;  %v159_v35 = vand.u32 127, %v156_v33 }
   0xa   :  { %v1347_v16 = vpack.c.bf16 %v32_v15, %v31_v14  ;;  %v1353_v19 = vpack.c.bf16 %v34_v18, %v33_v17  ;;  %v22_v20 = vld [vmem:[%s1810_s0 + $0x8] sm:$0xff]  ;;  %v155_v25 = vld [vmem:[%s1811_s1] sm:$0x1]  ;;  %s1528_s0 = smov 127   ;;  %vm1661_vm3 = vmpackc.low %vm172_vm2, %vm172_vm2  ;;  %s1533_s30 = smov 64   ;;  %vm1011_vm6 = vcmask 195584  }
   0xb   :  { %vm160_vm4 = vcmp.lt.s32.totalorder %v159_v35, %v157_v34  ;;  %v1146_v39 = vld [vmem:[%s1811_s1 + $0x8] sm:$0xff]  ;;  %v163_v42 = vld [vmem:[%s1811_s1] sm:$0xff]  ;;  %s1531_s1 = smov 88   ;;  %s1534_s6 = smov 80  }
   0xc   :  { %v1145_v37 = vsel %vm160_vm4, 1.0, %v1529_v36  ;;  %s1535_s7 = smov 112   ;;  %s1536_s8 = smov 56  }
   0xd   :  { %1334 = vmatpush3.bf16.xpose.msk.msra.mxu0 %vm1586_vm1, %v1329_v6  ;;  %s1537_s9 = smov 72   ;;  %s1538_s10 = smov 104  }
   0xe   :  { %1337 = vmatprep.subr.msk.bf16.mxu0 %vm1586_vm1, %v1335_v10  ;;  %s1539_s11 = smov 48   ;;  %s1540_s12 = smov 40  }
   0xf   :  { %s1541_s13 = smov 16   ;;  %s1542_s21 = smov 24  }
  0x10   :  { %s1543_s24 = smov [#allocation2]  }
  0x11   :  { %s1120_s25 = sshll.u32 %s1543_s24, 4  ;;  %s1121_s25 = int_to_ptr.vmem [resolvable:$true] %s1120_s25 }
  0x12   :  { %s1503_s27 = scalar_lea.vmem %s1121_s25, 256  ;;  %p1508_p1 = scmp.lt.s32.totalorder %s1121_s25, %s1121_s25 }
  0x13   :  { %p1504_p0 = scmp.ne.s32.totalorder %s1121_s25, %s1503_s27  ;;  %p1509_p2 = scmp.lt.s32.totalorder %s1503_s27, %s1503_s27 }
  0x15   :  { %1340 = vmatpush3.bf16.xpose.msk.msra.mxu0 %vm1586_vm1, %v1335_v10  ;;  %p1510_p3 = por %p1509_p2, %p1508_p1 }
  0x16   :  { %1343 = vmatprep.subr.msk.bf16.mxu0 %vm1586_vm1, %v1341_v13 }
  0x17   :  { %p1511_p4 = pnand %p1510_p3, %p1504_p0 }
  0x1d   :  { %1346 = vmatpush3.bf16.xpose.msk.msra.mxu0 %vm1586_vm1, %v1341_v13 }
  0x1e   :  { %1349 = vmatprep.subr.msk.bf16.mxu0 %vm1586_vm1, %v1347_v16 }
  0x25   :  { %1352 = vmatpush3.bf16.xpose.msk.msra.mxu0 %vm1586_vm1, %v1347_v16 }
  0x26   :  { %1355 = vmatprep.subr.msk.bf16.mxu0 %vm1586_vm1, %v1353_v19 }
  0x2d   :  { %1358 = vmatpush3.bf16.xpose.msk.msra.mxu0 %vm1586_vm1, %v1353_v19 }
  0x34   :  { %1254 = vmatmul.mubr.msk.f32.vlgmr.msra.gmra.mrb[0].mxu0 %vm35_vm0, %v22_v20 }
 0x107   :  { %v1255_v21 = vpop.f32.mrb[0].mxu0 }
 0x108   :  { %v144_v22 = vpop.f32.mrb[1].mxu0  ;;  %v1669_v32 = vmul.f32 0.35355338, %v1255_v21 }
 0x109   :  { %v1649_v23 = vpack.i.bf16 %v1255_v21, %v144_v22  ;;  %v1651_v24 = vmul.f32 0.35355338, %v144_v22 }
 0x10b   :  { %1432 = vrot.lane.b32.xlu0 %v1649_v23, %s1527_s2  ;;  %1260 = vmatprep.mubr.msk.f32.mxu1 %vm172_vm2, %v1651_v24 }
 0x10f   :  { %165 = vrot.lane.b32.xlu0 %v155_v25, %s1528_s0 }
 0x17d   :  { %v1433_v26 = vpop.permute.xlu0 %1432 }
 0x17e   :  { %v1435_v27 = vunpack.i.h.bf16 %v1433_v26  ;;  %v1434_v28 = vunpack.i.l.bf16 %v1433_v26 }
 0x180   :  { %v1359_v30 = vpack.c.bf16 %v1435_v27, %v1434_v28 }
 0x181   :  { %v166_v31 = vpop.permute.xlu0 %165 }
 0x182   :  { %1361 = vmatprep.subr.msk.bf16.mxu1 %vm1661_vm3, %v1359_v30  ;;  %1411 = vpush %v166_v31 }
 0x183   :  { %1364 = vmatpush3.bf16.xpose.msk.msra.mxu1 %vm1661_vm3, %v1359_v30 }
 0x18a   :  { %1261 = vmatmul.mubr.msk.f32.vlgmr.msra.gmra.mrb[0].mxu1 %vm172_vm2, %v1669_v32 }
 0x1b3   :  { %s1412_s23 = spop %1411 }
 0x1b4   :  { %v168_v38 = vstv %s1412_s23 }
 0x1b5   :  { %v170_v40 = vmul.f32 %v1145_v37, %v168_v38 }
 0x1b7   :  { %v176_v41 = vadd.f32 %v1146_v39, %v170_v40  ;;  %v171_v44 = vadd.f32 %v170_v40, %v163_v42 }
 0x1b9   :  { %178 = vrot.lane.b32.xlu1 %v176_v41, %s1530_s26  ;;  %v1685_v48 = vsel %vm172_vm2, %v171_v44, -1e+30 }
 0x22b   :  { %v179_v43 = vpop.permute.xlu1 %178 }
 0x22c   :  { %v1681_v45 = vsel %vm172_vm2, -1e+30, %v179_v43 }
 0x25d   :  { %v1262_v46 = vpop.f32.mrb[0].mxu1 }
 0x25e   :  { %v270_v47 = vadd.f32 %v1262_v46, %v1681_v45  ;;  %v264_v49 = vpop.f32.mrb[1].mxu1 }
 0x25f   :  { %v265_v50 = vadd.f32 %v264_v49, %v1685_v48 }
 0x260   :  { %v277_v51 = vsel %vm273_vm5, %v270_v47, -inf }
 0x261   :  { %278 = vmax.xlane.f32.xlu0 %v277_v51  ;;  %v274_v52 = vsel %vm273_vm5, %v265_v50, -inf }
 0x262   :  { %275 = vmax.xlane.f32.xlu1 %v274_v52 }
 0x2ee   :  { %v279_v53 = vpop.xlane.xlu0 %278 }
 0x2ef   :  { %v281_v54 = vsub.f32 %v270_v47, %v279_v53  ;;  %v276_v55 = vpop.xlane.xlu1 %275 }
 0x2f0   :  { %v280_v56 = vsub.f32 %v265_v50, %v276_v55 }
 0x2f1   :  { %v284_v57 = vmul.f32 1.442695, %v281_v54 }
 0x2f2   :  { %v282_v58 = vmul.f32 1.442695, %v280_v56 }
 0x2f3   :  { %1471 = vpow2.f32 %v284_v57 }
 0x2f4   :  { %1473 = vpow2.f32 %v282_v58 }
 0x2fd   :  { %v1472_v59 = vpop.eup %1471 }
 0x2fe   :  { %v1474_v60 = vpop.eup %1473  ;;  %v289_v61 = vsel %vm273_vm5, %v1472_v59, 0.0 }
 0x2ff   :  { %290 = vadd.xlane.f32.xlu1 %v289_v61  ;;  %v286_v62 = vsel %vm273_vm5, %v1474_v60, 0.0 }
 0x300   :  { %287 = vadd.xlane.f32.xlu0 %v286_v62 }
 0x310   :  { %1442 = vrot.lane.b32.xlu1 %v1649_v23, %s1531_s1 }
 0x314   :  { %383 = vrot.lane.b32.xlu1 %v1651_v24, %s1532_s29 }
 0x316   :  { %1437 = vrot.lane.b32.xlu0 %v1649_v23, %s1533_s30 }
 0x31a   :  { %385 = vrot.lane.b32.xlu0 %v1669_v32, %s1532_s29 }
 0x38c   :  { %v291_v63 = vpop.xlane.xlu1 %290 }
 0x38d   :  { %1475 = vrcp.f32 %v291_v63  ;;  %v288_v0 = vpop.xlane.xlu0 %287 }
 0x38e   :  { %1477 = vrcp.f32 %v288_v0 }
 0x390   :  { %v1443_v1 = vpop.permute.xlu1 %1442 }
 0x391   :  { %v1438_v2 = vpop.permute.xlu0 %1437  ;;  %v1445_v3 = vunpack.i.h.bf16 %v1443_v1  ;;  %v1444_v5 = vunpack.i.l.bf16 %v1443_v1 }
 0x392   :  { %v1440_v6 = vunpack.i.h.bf16 %v1438_v2  ;;  %v1439_v7 = vunpack.i.l.bf16 %v1438_v2 }
 0x393   :  { %v1369_v9 = vpack.c.bf16 %v1445_v3, %v1444_v5 }
 0x394   :  { %v1365_v8 = vpack.c.bf16 %v1440_v6, %v1439_v7  ;;  %v384_v14 = vpop.permute.xlu1 %383 }
 0x395   :  { %v386_v15 = vpop.permute.xlu0 %385 }
 0x396   :  { %1366 = vmatprep.subr.bf16.mxu1 %v1365_v8 }
 0x397   :  { %v1476_v10 = vpop.eup %1475  ;;  %1368 = vmatpush3.bf16.msra.mxu1 %v1365_v8 }
 0x398   :  { %v1478_v11 = vpop.eup %1477  ;;  %1371 = vmatprep.subr.msk.bf16.mxu1 %vm1661_vm3, %v1369_v9  ;;  %v295_v13 = vmul.f32 %v1476_v10, %v1472_v59 }
 0x399   :  { %v294_v12 = vmul.f32 %v1478_v11, %v1474_v60 }
 0x39b   :  { %1267 = vmatprep.mubr.msk.f32.mxu1 %vm273_vm5, %v294_v12 }
 0x39c   :  { %1268 = vmatmul.mubr.msk.f32.vlgmr.msra.gmra.mrb[2].mxu1 %vm273_vm5, %v295_v13 }
 0x39d   :  { %1274 = vmatprep.mubr.msk.f32.mxu1 %vm172_vm2, %v384_v14 }
 0x3a0   :  { %1374 = vmatpush3.bf16.xpose.msk.msra.mxu1 %vm1661_vm3, %v1369_v9 }
 0x3a7   :  { %1275 = vmatmul.mubr.msk.f32.vlgmr.msra.gmra.mrb[4].mxu1 %vm172_vm2, %v386_v15 }
 0x46f   :  { %v1704_v16 = vpop.f32.mrb[2].mxu1 }
 0x470   :  { %v1706_v17 = vpop.f32.mrb[3].mxu1 }
 0x47a   :  { %v1276_v18 = vpop.f32.mrb[4].mxu1 }
 0x47b   :  { %v471_v19 = vadd.f32 %v1276_v18, %v1681_v45  ;;  %v465_v20 = vpop.f32.mrb[5].mxu1 }
 0x47c   :  { %v466_v21 = vadd.f32 %v465_v20, %v1685_v48 }
 0x47d   :  { %v477_v22 = vsel %vm273_vm5, %v471_v19, -inf }
 0x47e   :  { %478 = vmax.xlane.f32.xlu0 %v477_v22  ;;  %v474_v25 = vsel %vm273_vm5, %v466_v21, -inf }
 0x47f   :  { %475 = vmax.xlane.f32.xlu1 %v474_v25 }
 0x50b   :  { %v479_v26 = vpop.xlane.xlu0 %478 }
 0x50c   :  { %v481_v27 = vsub.f32 %v471_v19, %v479_v26  ;;  %v476_v28 = vpop.xlane.xlu1 %475 }
 0x50d   :  { %v480_v30 = vsub.f32 %v466_v21, %v476_v28 }
 0x50e   :  { %v484_v31 = vmul.f32 1.442695, %v481_v27 }
 0x50f   :  { %v482_v33 = vmul.f32 1.442695, %v480_v30 }
 0x510   :  { %1479 = vpow2.f32 %v484_v31 }
 0x511   :  { %1481 = vpow2.f32 %v482_v33 }
 0x51a   :  { %v1480_v34 = vpop.eup %1479 }
 0x51b   :  { %v1482_v35 = vpop.eup %1481  ;;  %v489_v36 = vsel %vm273_vm5, %v1480_v34, 0.0 }
 0x51c   :  { %490 = vadd.xlane.f32.xlu1 %v489_v36  ;;  %v486_v37 = vsel %vm273_vm5, %v1482_v35, 0.0 }
 0x51d   :  { %487 = vadd.xlane.f32.xlu0 %v486_v37 }
 0x52d   :  { %1452 = vrot.lane.b32.xlu1 %v1649_v23, %s1534_s6 }
 0x531   :  { %583 = vrot.lane.b32.xlu1 %v1651_v24, %s1535_s7 }
 0x533   :  { %1447 = vrot.lane.b32.xlu0 %v1649_v23, %s1536_s8 }
 0x537   :  { %585 = vrot.lane.b32.xlu0 %v1669_v32, %s1535_s7 }
 0x5a9   :  { %v491_v38 = vpop.xlane.xlu1 %490 }
 0x5aa   :  { %1483 = vrcp.f32 %v491_v38  ;;  %v488_v39 = vpop.xlane.xlu0 %487 }
 0x5ab   :  { %1485 = vrcp.f32 %v488_v39 }
 0x5ad   :  { %v1453_v40 = vpop.permute.xlu1 %1452 }
 0x5ae   :  { %v1448_v41 = vpop.permute.xlu0 %1447  ;;  %v1455_v42 = vunpack.i.h.bf16 %v1453_v40  ;;  %v1454_v43 = vunpack.i.l.bf16 %v1453_v40 }
 0x5af   :  { %v1450_v44 = vunpack.i.h.bf16 %v1448_v41  ;;  %v1449_v46 = vunpack.i.l.bf16 %v1448_v41 }
 0x5b0   :  { %v1379_v49 = vpack.c.bf16 %v1455_v42, %v1454_v43 }
 0x5b1   :  { %v1375_v47 = vpack.c.bf16 %v1450_v44, %v1449_v46  ;;  %v584_v54 = vpop.permute.xlu1 %583 }
 0x5b2   :  { %v586_v55 = vpop.permute.xlu0 %585 }
 0x5b3   :  { %1376 = vmatprep.subr.bf16.mxu1 %v1375_v47 }
 0x5b4   :  { %v1484_v50 = vpop.eup %1483  ;;  %1378 = vmatpush3.bf16.msra.mxu1 %v1375_v47 }
 0x5b5   :  { %v1486_v51 = vpop.eup %1485  ;;  %1381 = vmatprep.subr.msk.bf16.mxu1 %vm1661_vm3, %v1379_v49  ;;  %v495_v53 = vmul.f32 %v1484_v50, %v1480_v34 }
 0x5b6   :  { %v494_v52 = vmul.f32 %v1486_v51, %v1482_v35 }
 0x5b8   :  { %1281 = vmatprep.mubr.msk.f32.mxu1 %vm273_vm5, %v494_v52 }
 0x5b9   :  { %1282 = vmatmul.mubr.msk.f32.vlgmr.msra.gmra.mrb[6].mxu1 %vm273_vm5, %v495_v53 }
 0x5ba   :  { %1288 = vmatprep.mubr.msk.f32.mxu1 %vm172_vm2, %v584_v54 }
 0x5bd   :  { %1384 = vmatpush3.bf16.xpose.msk.msra.mxu1 %vm1661_vm3, %v1379_v49 }
 0x5c4   :  { %1289 = vmatmul.mubr.msk.f32.vlgmr.msra.gmra.mrb[8].mxu1 %vm172_vm2, %v586_v55 }
 0x68c   :  { %v1726_v56 = vpop.f32.mrb[6].mxu1 }
 0x68d   :  { %v1728_v57 = vpop.f32.mrb[7].mxu1 }
 0x697   :  { %v1290_v58 = vpop.f32.mrb[8].mxu1 }
 0x698   :  { %v671_v59 = vadd.f32 %v1290_v58, %v1681_v45  ;;  %v665_v60 = vpop.f32.mrb[9].mxu1  ;;  %v1015_v58 = vld [vmem:[%s1813_s3 + $0x8] sm:$0xff] }
 0x699   :  { %v666_v61 = vadd.f32 %v665_v60, %v1685_v48 }
 0x69a   :  { %v677_v62 = vsel %vm273_vm5, %v671_v59, -inf }
 0x69b   :  { %678 = vmax.xlane.f32.xlu0 %v677_v62  ;;  %v674_v63 = vsel %vm273_vm5, %v666_v61, -inf }
 0x69c   :  { %675 = vmax.xlane.f32.xlu1 %v674_v63 }
 0x728   :  { %v679_v0 = vpop.xlane.xlu0 %678 }
 0x729   :  { %v681_v1 = vsub.f32 %v671_v59, %v679_v0  ;;  %v676_v2 = vpop.xlane.xlu1 %675  ;;  %v1016_v59 = vld [vmem:[%s1813_s3 + $0x10] sm:$0xff] }
 0x72a   :  { %v680_v3 = vsub.f32 %v666_v61, %v676_v2  ;;  %v1017_v61 = vld [vmem:[%s1813_s3 + $0x18] sm:$0xff] }
 0x72b   :  { %v684_v5 = vmul.f32 1.442695, %v681_v1  ;;  %v1405_v62 = vpack.c.bf16 %v1017_v61, %v1016_v59 }
 0x72c   :  { %v682_v6 = vmul.f32 1.442695, %v680_v3 }
 0x72d   :  { %1487 = vpow2.f32 %v684_v5 }
 0x72e   :  { %1489 = vpow2.f32 %v682_v6 }
 0x737   :  { %v1488_v7 = vpop.eup %1487 }
 0x738   :  { %v1490_v8 = vpop.eup %1489  ;;  %v689_v9 = vsel %vm273_vm5, %v1488_v7, 0.0 }
 0x739   :  { %690 = vadd.xlane.f32.xlu1 %v689_v9  ;;  %v686_v10 = vsel %vm273_vm5, %v1490_v8, 0.0 }
 0x73a   :  { %687 = vadd.xlane.f32.xlu0 %v686_v10 }
 0x74a   :  { %1462 = vrot.lane.b32.xlu1 %v1649_v23, %s1537_s9 }
 0x74e   :  { %783 = vrot.lane.b32.xlu1 %v1651_v24, %s1538_s10 }
 0x750   :  { %1457 = vrot.lane.b32.xlu0 %v1649_v23, %s1539_s11 }
 0x754   :  { %785 = vrot.lane.b32.xlu0 %v1669_v32, %s1538_s10 }
 0x7c6   :  { %v691_v11 = vpop.xlane.xlu1 %690 }
 0x7c7   :  { %1491 = vrcp.f32 %v691_v11  ;;  %v688_v12 = vpop.xlane.xlu0 %687 }
 0x7c8   :  { %1493 = vrcp.f32 %v688_v12 }
 0x7ca   :  { %v1463_v13 = vpop.permute.xlu1 %1462 }
 0x7cb   :  { %v1458_v14 = vpop.permute.xlu0 %1457  ;;  %v1465_v15 = vunpack.i.h.bf16 %v1463_v13  ;;  %v1464_v18 = vunpack.i.l.bf16 %v1463_v13  ;;  %v1019_v13 = vld [vmem:[%s1814_s4 + $0x8] sm:$0xff] }
 0x7cc   :  { %v1460_v19 = vunpack.i.h.bf16 %v1458_v14  ;;  %v1459_v20 = vunpack.i.l.bf16 %v1458_v14 }
 0x7cd   :  { %v1389_v22 = vpack.c.bf16 %v1465_v15, %v1464_v18 }
 0x7ce   :  { %v1385_v21 = vpack.c.bf16 %v1460_v19, %v1459_v20  ;;  %v784_v27 = vpop.permute.xlu1 %783 }
 0x7cf   :  { %v786_v28 = vpop.permute.xlu0 %785 }
 0x7d0   :  { %1386 = vmatprep.subr.bf16.mxu1 %v1385_v21 }
 0x7d1   :  { %v1492_v25 = vpop.eup %1491  ;;  %1388 = vmatpush3.bf16.msra.mxu1 %v1385_v21 }
 0x7d2   :  { %v1494_v24 = vpop.eup %1493  ;;  %1391 = vmatprep.subr.msk.bf16.mxu1 %vm1661_vm3, %v1389_v22  ;;  %v695_v26 = vmul.f32 %v1492_v25, %v1488_v7 }
 0x7d3   :  { %v694_v32 = vmul.f32 %v1494_v24, %v1490_v8 }
 0x7d5   :  { %1295 = vmatprep.mubr.msk.f32.mxu1 %vm273_vm5, %v694_v32 }
 0x7d6   :  { %1296 = vmatmul.mubr.msk.f32.vlgmr.msra.gmra.mrb[10].mxu1 %vm273_vm5, %v695_v26 }
 0x7d7   :  { %1302 = vmatprep.mubr.msk.f32.mxu1 %vm172_vm2, %v784_v27 }
 0x7da   :  { %1394 = vmatpush3.bf16.xpose.msk.msra.mxu1 %vm1661_vm3, %v1389_v22 }
 0x7e1   :  { %1303 = vmatmul.mubr.msk.f32.vlgmr.msra.gmra.mrb[12].mxu1 %vm172_vm2, %v786_v28 }
 0x8a9   :  { %v1297_v30 = vpop.f32.mrb[10].mxu1 }
 0x8aa   :  { %v774_v31 = vpop.f32.mrb[11].mxu1 }
 0x8b4   :  { %v1304_v33 = vpop.f32.mrb[12].mxu1 }
 0x8b5   :  { %v871_v34 = vadd.f32 %v1304_v33, %v1681_v45  ;;  %v865_v35 = vpop.f32.mrb[13].mxu1 }
 0x8b6   :  { %v866_v36 = vadd.f32 %v865_v35, %v1685_v48 }
 0x8b7   :  { %v877_v37 = vsel %vm273_vm5, %v871_v34, -inf }
 0x8b8   :  { %878 = vmax.xlane.f32.xlu0 %v877_v37  ;;  %v874_v38 = vsel %vm273_vm5, %v866_v36, -inf }
 0x8b9   :  { %875 = vmax.xlane.f32.xlu1 %v874_v38 }
 0x945   :  { %v879_v39 = vpop.xlane.xlu0 %878 }
 0x946   :  { %v881_v29 = vsub.f32 %v871_v34, %v879_v39  ;;  %v876_v40 = vpop.xlane.xlu1 %875 }
 0x947   :  { %v880_v41 = vsub.f32 %v866_v36, %v876_v40 }
 0x948   :  { %v884_v42 = vmul.f32 1.442695, %v881_v29 }
 0x949   :  { %v882_v43 = vmul.f32 1.442695, %v880_v41 }
 0x94a   :  { %1495 = vpow2.f32 %v884_v42 }
 0x94b   :  { %1497 = vpow2.f32 %v882_v43 }
 0x954   :  { %v1496_v44 = vpop.eup %1495 }
 0x955   :  { %v1498_v46 = vpop.eup %1497  ;;  %v889_v45 = vsel %vm273_vm5, %v1496_v44, 0.0 }
 0x956   :  { %890 = vadd.xlane.f32.xlu1 %v889_v45  ;;  %v886_v48 = vsel %vm273_vm5, %v1498_v46, 0.0 }
 0x957   :  { %887 = vadd.xlane.f32.xlu0 %v886_v48 }
 0x967   :  { %985 = vrot.lane.b32.xlu1 %v1728_v57, %s1530_s26 }
 0x96b   :  { %987 = vrot.lane.b32.xlu1 %v1726_v56, %s1530_s26 }
 0x96d   :  { %1467 = vrot.lane.b32.xlu0 %v1649_v23, %s1540_s12  ;;  %v1014_v23 = vld [vmem:[%s1813_s3] sm:$0xff] }
 0x96e   :  { %v1399_v60 = vpack.c.bf16 %v1015_v58, %v1014_v23 }
 0x96f   :  { %995 = vrot.lane.b32.xlu1 %v1297_v30, %s1541_s13 }
 0x970   :  { %1401 = vmatprep.subr.msk.bf16.mxu0 %vm1586_vm1, %v1399_v60 }
 0x971   :  { %993 = vrot.lane.b32.xlu0 %v774_v31, %s1541_s13  ;;  %1404 = vmatpush3.bf16.xpose.msk.msra.mxu0 %vm1586_vm1, %v1399_v60 }
 0x972   :  { %1407 = vmatprep.subr.msk.bf16.mxu0 %vm1586_vm1, %v1405_v62 }
 0x979   :  { %1410 = vmatpush3.bf16.xpose.msk.msra.mxu0 %vm1586_vm1, %v1405_v62 }
 0x9e3   :  { %v891_v47 = vpop.xlane.xlu1 %890 }
 0x9e4   :  { %1499 = vrcp.f32 %v891_v47  ;;  %v888_v49 = vpop.xlane.xlu0 %887 }
 0x9e5   :  { %1501 = vrcp.f32 %v888_v49 }
 0x9e7   :  { %v986_v1 = vpop.permute.xlu1 %985 }
 0x9e8   :  { %v1468_v50 = vpop.permute.xlu0 %1467  ;;  %v1007_v6 = vsel %vm172_vm2, %v1706_v17, %v986_v1  ;;  %v1018_v17 = vld [vmem:[%s1814_s4] sm:$0xff] }
 0x9e9   :  { %v1470_v51 = vunpack.i.h.bf16 %v1468_v50  ;;  %v1469_v52 = vunpack.i.l.bf16 %v1468_v50 }
 0x9eb   :  { %v1395_v53 = vpack.c.bf16 %v1470_v51, %v1469_v52  ;;  %v988_v2 = vpop.permute.xlu1 %987 }
 0x9ec   :  { %v994_v5 = vpop.permute.xlu0 %993  ;;  %v1008_v8 = vsel %vm172_vm2, %v1704_v16, %v988_v2 }
 0x9ed   :  { %1396 = vmatprep.subr.bf16.mxu1 %v1395_v53  ;;  %v1009_v4 = vsel %vm273_vm5, %v1007_v6, %v994_v5 }
 0x9ee   :  { %v1500_v54 = vpop.eup %1499  ;;  %1398 = vmatpush3.bf16.msra.mxu1 %v1395_v53 }
 0x9ef   :  { %v1502_v55 = vpop.eup %1501  ;;  %v895_v56 = vmul.f32 %v1500_v54, %v1496_v44  ;;  %v996_v3 = vpop.permute.xlu1 %995 }
 0x9f0   :  { %v894_v57 = vmul.f32 %v1502_v55, %v1498_v46  ;;  %v1010_v10 = vsel %vm273_vm5, %v1008_v8, %v996_v3 }
 0x9f2   :  { %1309 = vmatprep.mubr.msk.f32.mxu1 %vm273_vm5, %v894_v57 }
 0x9f3   :  { %1310 = vmatmul.mubr.msk.f32.vlgmr.msra.gmra.mrb[14].mxu1 %vm273_vm5, %v895_v56 }
 0xac6   :  { %v1311_v63 = vpop.f32.mrb[14].mxu1 }
 0xac7   :  { %1003 = vrot.lane.b32.xlu1 %v1311_v63, %s1542_s21  ;;  %v974_v0 = vpop.f32.mrb[15].mxu1 }
 0xac8   :  { %1001 = vrot.lane.b32.xlu0 %v974_v0, %s1542_s21 }
 0xb39   :  { %v1004_v7 = vpop.permute.xlu1 %1003 }
 0xb3a   :  { %v1002_v9 = vpop.permute.xlu0 %1001  ;;  %v1013_v12 = vsel %vm1011_vm6, %v1010_v10, %v1004_v7 }
 0xb3b   :  { %v1012_v11 = vsel %vm1011_vm6, %v1009_v4, %v1002_v9 }
 0xb3c   :  { %1320 = vmatprep.mubr.msk.f32.mxu0 %vm35_vm0, %v1012_v11 }
 0xb3d   :  { %1321 = vmatmul.mubr.msk.f32.vlgmr.msra.gmra.mrb[2].mxu0 %vm35_vm0, %v1013_v12 }
 0xc10   :  { %v1322_v16 = vpop.f32.mrb[2].mxu0 }
 0xc11   :  { %v1110_v14 = vadd.f32 %v1322_v16, %v1019_v13  ;;  %v1104_v15 = vpop.f32.mrb[3].mxu0 }
 0xc12   :  { %v1105_v18 = vadd.f32 %v1104_v15, %v1018_v17 }
 0xc13   :  { %1114 = vst.msk [vmem:[#allocation2 + $0x8] sm:$0xff] %vm35_vm0, %v1110_v14 }
 0xc14   :  { %1113 = vst.msk [vmem:[#allocation2] sm:$0xff] %vm35_vm0, %v1105_v18 }
 0xc15   :  { %1514 = shalt.err (!%p1511_p4)
}
 0xc16   :  { %s1515_s1 = scalar_lea.hbm %s1815_s5, 256 }
 0xc17   :  { %p1516_p5 = scmp.ne.s32.totalorder %s1815_s5, %s1515_s1  ;;  %p1519_p6 = scmp.lt.u32.totalorder %s1515_s1, %s1815_s5 }
 0xc19   :  { %p1521_p7 = pnand %p1519_p6, %p1516_p5 }
 0xc1b   :  { %1524 = shalt.err (!%p1521_p7)
}
 0xc1c   :  { %s1544_s8 = smov 128  }
 0xc1d   :  { %1126 = dma.vmem_to_hbm [thread:$0]  %s1121_s25, 256, %s1815_s5, [#allocation3], %s1544_s8, %s1544_s8, %s1530_s26  }
 0xc1e   :  { %1525 = dma.done.wait [#allocation3], 256  }
 0xc1f   :  { %1526 = vsyncadd [#allocation3], 4294967040 }
 0xc20   :  { %1130 = vsyncpa [#allocation3], 1 }

</bundles_post_ra>
